<compile_context>
chip_gen: v7x
topology: tpu7x:2x2x1
jax: 0.10.0
libtpu: 0.0.40
codegen_flags: <defaults>
</compile_context>

<pallas_src>
import functools

import jax
import jax.numpy as jnp
from jax.experimental import pallas as pl
from jax.experimental.pallas import tpu as pltpu


def _round_up(x: int, m: int) -> int:
    return ((x + m - 1) // m) * m


def _physical_vmem_bytes() -> int:
    # Generation-aware VMEM capacity; fall back to the v7x worst case (64 MiB).
    try:
        info = pltpu.get_tpu_info()
        return int(getattr(info, "vmem_capacity_bytes", 64 * 1024 * 1024))
    except Exception:
        return 64 * 1024 * 1024


def _resident_spec(block_shape):
    """Grid-invariant operand: constant index_map; single-buffered if supported."""
    index_map = lambda i: (0,) * len(block_shape)
    if hasattr(pl, "Buffered"):
        try:
            return pl.BlockSpec(block_shape, index_map,
                                pipeline_mode=pl.Buffered(1))
        except Exception:
            pass
    return pl.BlockSpec(block_shape, index_map)


def projection_head_kernel(x_ref, w1_ref, b1_ref, w2_ref, b2_ref, o_ref):
    # Load biases once (hoisted; JAX does not CSE broadcast_in_dim).
    b1 = b1_ref[...]  # (1, hidden)  f32
    b2 = b2_ref[...]  # (1, out)     f32

    # Cast x to bf16 in-kernel (x arrives in its original dtype from HBM).
    x = x_ref[...].astype(jnp.bfloat16)

    # Linear 1: bf16 operands on the MXU, f32 accumulation.
    h = jnp.dot(x, w1_ref[...], preferred_element_type=jnp.float32)
    # Bias + ReLU in f32, then immediately drop to bf16 (halves spill traffic).
    h = jnp.maximum(h + b1, 0.0).astype(jnp.bfloat16)

    # Linear 2: bf16 on the MXU, f32 accumulation, f32 bias add.
    y = jnp.dot(h, w2_ref[...], preferred_element_type=jnp.float32) + b2

    # F.normalize(y, dim=1): y / max(||y||, 1e-12) == y * rsqrt(max(sq, 1e-24))
    sq = jnp.sum(y * y, axis=1, keepdims=True)
    inv = jax.lax.rsqrt(jnp.maximum(sq, 1e-24))
    o_ref[...] = (y * inv).astype(o_ref.dtype)


def prepare_params(w1, b1, w2, b2):
    """One-time parameter prep (cast to MXU dtypes).  Call once, reuse."""
    return (w1.astype(jnp.bfloat16),
            b1.astype(jnp.float32).reshape(1, -1),
            w2.astype(jnp.bfloat16),
            b2.astype(jnp.float32).reshape(1, -1))


@functools.partial(jax.jit, static_argnames=("block_b",))
def projection_head(x, w1b, b1p, w2b, b2p, *, block_b=1024):
    """Fused Linear -> ReLU -> Linear -> L2-normalize (dim=1).

    `w1b/b1p/w2b/b2p` come from `prepare_params` (bf16 weights, f32 biases).
    """
    B, in_dim = x.shape
    hidden = w1b.shape[1]
    out_dim = w2b.shape[1]
    out_dtype = x.dtype

    # Balanced batch tiling: multiple-of-16 sublane tiles (bf16-friendly),
    # no pathological tail padding, and >=2 grid steps for large B so both
    # v7x TensorCores are used (dimension_semantics=("parallel",)).
    n_tiles = pl.cdiv(B, block_b)
    if B >= 64 and n_tiles < 2:
        n_tiles = 2
    TB = _round_up(pl.cdiv(B, n_tiles), 16)
    B_pad = TB * n_tiles

    xp = jnp.pad(x, ((0, B_pad - B), (0, 0))) if B_pad != B else x

    # VMEM working-set estimate: double-buffered x/out tiles, single-buffered
    # resident bf16 weights + f32 biases, in-kernel f32/bf16 intermediates.
    x_bytes = jnp.dtype(x.dtype).itemsize
    o_bytes = jnp.dtype(out_dtype).itemsize
    est = (2 * TB * in_dim * x_bytes                      # x tiles (double-buffered)
           + 2 * TB * out_dim * o_bytes                   # out tiles (double-buffered)
           + (in_dim * hidden + hidden * out_dim) * 2     # resident bf16 weights
           + (hidden + out_dim) * 4                       # resident f32 biases
           + TB * hidden * (4 + 2)                        # h in f32 + bf16
           + TB * out_dim * 4)                            # y in f32
    cap = int(0.75 * _physical_vmem_bytes())              # headroom (v7x: ~48 MiB)
    vmem_limit = int(min(max(32 * 1024 * 1024, 2 * est), cap))

    out = pl.pallas_call(
        projection_head_kernel,
        out_shape=jax.ShapeDtypeStruct((B_pad, out_dim), out_dtype),
        grid_spec=pltpu.PrefetchScalarGridSpec(
            num_scalar_prefetch=0,
            grid=(n_tiles,),
            in_specs=[
                pl.BlockSpec((TB, in_dim), lambda i: (i, 0)),  # x: tiled over B
                _resident_spec((in_dim, hidden)),              # w1: resident
                _resident_spec((1, hidden)),                   # b1: resident
                _resident_spec((hidden, out_dim)),             # w2: resident
                _resident_spec((1, out_dim)),                  # b2: resident
            ],
            out_specs=pl.BlockSpec((TB, out_dim), lambda i: (i, 0)),
        ),
        compiler_params=pltpu.CompilerParams(
            dimension_semantics=("parallel",),   # batch axis shardable (megacore)
            vmem_limit_bytes=vmem_limit,
        ),
    )(xp, w1b, b1p, w2b, b2p)

    return out[:B] if B_pad != B else out


def reference_bf16(x, w1, b1, w2, b2):
    """Same math as the kernel (bf16 matmuls, f32 accumulate/epilogue)."""
    h = jnp.dot(x.astype(jnp.bfloat16), w1.astype(jnp.bfloat16),
                preferred_element_type=jnp.float32) + b1
    h = jnp.maximum(h, 0.0)
    y = jnp.dot(h.astype(jnp.bfloat16), w2.astype(jnp.bfloat16),
                preferred_element_type=jnp.float32) + b2
    n = jnp.sqrt(jnp.sum(y * y, axis=1, keepdims=True))
    return y / jnp.maximum(n, 1e-12)


def reference_f32(x, w1, b1, w2, b2):
    h = jnp.maximum(x @ w1 + b1, 0.0)
    y = h @ w2 + b2
    n = jnp.sqrt(jnp.sum(y * y, axis=1, keepdims=True))
    return y / jnp.maximum(n, 1e-12)


if __name__ == "__main__":
    # Small shapes consistent with the module (hidden/out defaults 512/128).
    B, in_dim, hidden_dim, out_dim = 16, 64, 512, 128

    key = jax.random.PRNGKey(0)
    kx, kw1, kb1, kw2, kb2 = jax.random.split(key, 5)

    x = jax.random.normal(kx, (B, in_dim), dtype=jnp.float32)
    lim1 = 1.0 / (in_dim ** 0.5)
    lim2 = 1.0 / (hidden_dim ** 0.5)
    w1 = jax.random.uniform(kw1, (in_dim, hidden_dim), jnp.float32, -lim1, lim1)
    b1 = jax.random.uniform(kb1, (hidden_dim,), jnp.float32, -lim1, lim1)
    w2 = jax.random.uniform(kw2, (hidden_dim, out_dim), jnp.float32, -lim2, lim2)
    b2 = jax.random.uniform(kb2, (out_dim,), jnp.float32, -lim2, lim2)

    # One-time parameter prep (hoisted out of the per-call path).
    params = prepare_params(w1, b1, w2, b2)

    out = jax.block_until_ready(projection_head(x, *params))
    assert out.shape == (B, out_dim)

    ref_b = reference_bf16(x, w1, b1, w2, b2)
    ref_f = reference_f32(x, w1, b1, w2, b2)
    assert jnp.allclose(out, ref_b, atol=5e-3, rtol=5e-3), "mismatch vs bf16 reference"
    assert jnp.allclose(out, ref_f, atol=3e-2, rtol=3e-2), "mismatch vs f32 reference"
    assert jnp.allclose(jnp.linalg.norm(out.astype(jnp.float32), axis=1), 1.0,
                        atol=1e-3)

    # Batch that is not a multiple of the sublane/tile size (wrapper pads the
    # batch rows only and slices the result back).
    B2 = 10
    x2 = jax.random.normal(jax.random.PRNGKey(1), (B2, in_dim), dtype=jnp.float32)
    out2 = jax.block_until_ready(projection_head(x2, *params))
    ref2 = reference_bf16(x2, w1, b1, w2, b2)
    assert out2.shape == (B2, out_dim)
    assert jnp.allclose(out2, ref2, atol=5e-3, rtol=5e-3), "mismatch (padded batch)"

    print("KERNEL_OK")
</pallas_src>

<mosaic_0001>
module attributes {stable_mosaic.version = 11 : i64} {
  func.func @projection_head_kernel(%arg0: i32, %arg1: memref<16x64xf32, #tpu.memory_space<vmem>>, %arg2: memref<64x512xbf16, #tpu.memory_space<vmem>>, %arg3: memref<1x512xf32, #tpu.memory_space<vmem>>, %arg4: memref<512x128xbf16, #tpu.memory_space<vmem>>, %arg5: memref<1x128xf32, #tpu.memory_space<vmem>>, %arg6: memref<16x128xf32, #tpu.memory_space<vmem>>) attributes {dimension_semantics = [#tpu.dimension_semantics<parallel>], iteration_bounds = array<i64: 1>, scalar_prefetch = 0 : i64, scratch_operands = 0 : i64, tpu.core_type = #tpu.core_type<tc>, window_params = [{transform_indices = @transform_0, window_bounds = array<i64: 16, 64>}, {pipeline_mode = #tpu.pipeline_mode<synchronous>, transform_indices = @transform_1, window_bounds = array<i64: 64, 512>}, {pipeline_mode = #tpu.pipeline_mode<synchronous>, transform_indices = @transform_2, window_bounds = array<i64: 1, 512>}, {pipeline_mode = #tpu.pipeline_mode<synchronous>, transform_indices = @transform_3, window_bounds = array<i64: 512, 128>}, {pipeline_mode = #tpu.pipeline_mode<synchronous>, transform_indices = @transform_4, window_bounds = array<i64: 1, 128>}, {transform_indices = @transform_5, window_bounds = array<i64: 16, 128>}]} {
    %c0 = arith.constant 0 : index
    %c0_0 = arith.constant 0 : index
    %0 = vector.load %arg3[%c0, %c0_0] : memref<1x512xf32, #tpu.memory_space<vmem>>, vector<1x512xf32>
    %c0_1 = arith.constant 0 : index
    %c0_2 = arith.constant 0 : index
    %1 = vector.load %arg5[%c0_1, %c0_2] : memref<1x128xf32, #tpu.memory_space<vmem>>, vector<1x128xf32>
    %c0_3 = arith.constant 0 : index
    %c0_4 = arith.constant 0 : index
    %2 = vector.load %arg1[%c0_3, %c0_4] : memref<16x64xf32, #tpu.memory_space<vmem>>, vector<16x64xf32>
    %3 = arith.truncf %2 : vector<16x64xf32> to vector<16x64xbf16>
    %c0_5 = arith.constant 0 : index
    %c0_6 = arith.constant 0 : index
    %4 = vector.load %arg2[%c0_5, %c0_6] : memref<64x512xbf16, #tpu.memory_space<vmem>>, vector<64x512xbf16>
    %cst = arith.constant dense<0.000000e+00> : vector<16x512xf32>
    %5 = tpu.matmul %3, %4, %cst {dimension_numbers = #tpu.dot_dimension_numbers<[1], [0], [0], [1], [0, 0, 1, 1], [], []>} : vector<16x64xbf16>, vector<64x512xbf16>, vector<16x512xf32> -> vector<16x512xf32>
    %6 = vector.broadcast %0 : vector<1x512xf32> to vector<16x512xf32>
    %7 = arith.addf %5, %6 : vector<16x512xf32>
    %cst_7 = arith.constant 0.000000e+00 : f32
    %8 = vector.broadcast %cst_7 : f32 to vector<16x512xf32>
    %9 = arith.maximumf %7, %8 : vector<16x512xf32>
    %10 = arith.truncf %9 : vector<16x512xf32> to vector<16x512xbf16>
    %c0_8 = arith.constant 0 : index
    %c0_9 = arith.constant 0 : index
    %11 = vector.load %arg4[%c0_8, %c0_9] : memref<512x128xbf16, #tpu.memory_space<vmem>>, vector<512x128xbf16>
    %cst_10 = arith.constant dense<0.000000e+00> : vector<16x128xf32>
    %12 = tpu.matmul %10, %11, %cst_10 {dimension_numbers = #tpu.dot_dimension_numbers<[1], [0], [0], [1], [0, 0, 1, 1], [], []>} : vector<16x512xbf16>, vector<512x128xbf16>, vector<16x128xf32> -> vector<16x128xf32>
    %13 = vector.broadcast %1 : vector<1x128xf32> to vector<16x128xf32>
    %14 = arith.addf %12, %13 : vector<16x128xf32>
    %15 = arith.mulf %14, %14 : vector<16x128xf32>
    %cst_11 = arith.constant dense<0.000000e+00> : vector<16xf32>
    %16 = vector.multi_reduction <add>, %15, %cst_11 [1] : vector<16x128xf32> to vector<16xf32>
    %17 = vector.shape_cast %16 : vector<16xf32> to vector<16x1xf32>
    %cst_12 = arith.constant 1.000000e-24 : f32
    %18 = vector.broadcast %cst_12 : f32 to vector<16x1xf32>
    %19 = arith.maximumf %17, %18 : vector<16x1xf32>
    %20 = math.rsqrt %19 : vector<16x1xf32>
    %21 = vector.broadcast %20 : vector<16x1xf32> to vector<16x128xf32>
    %22 = arith.mulf %14, %21 : vector<16x128xf32>
    %c0_13 = arith.constant 0 : index
    %c0_14 = arith.constant 0 : index
    %23 = vector.load %arg6[%c0_13, %c0_14] : memref<16x128xf32, #tpu.memory_space<vmem>>, vector<16x128xf32>
    tpu.vector_store %arg6[%c0_13, %c0_14], %22 {strides = array<i32>} : memref<16x128xf32, #tpu.memory_space<vmem>>, vector<16x128xf32>,
    return
  }
  func.func @transform_0(%arg0: i32) -> (i32, i32) {
    %c0_i32 = arith.constant 0 : i32
    %c0_i32_0 = arith.constant 0 : i32
    return %arg0, %c0_i32 : i32, i32
  }
  func.func @transform_1(%arg0: i32) -> (i32, i32) {
    %c0_i32 = arith.constant 0 : i32
    %c0_i32_0 = arith.constant 0 : i32
    %c0_i32_1 = arith.constant 0 : i32
    return %c0_i32, %c0_i32_0 : i32, i32
  }
  func.func @transform_2(%arg0: i32) -> (i32, i32) {
    %c0_i32 = arith.constant 0 : i32
    %c0_i32_0 = arith.constant 0 : i32
    %c0_i32_1 = arith.constant 0 : i32
    return %c0_i32, %c0_i32_0 : i32, i32
  }
  func.func @transform_3(%arg0: i32) -> (i32, i32) {
    %c0_i32 = arith.constant 0 : i32
    %c0_i32_0 = arith.constant 0 : i32
    %c0_i32_1 = arith.constant 0 : i32
    return %c0_i32, %c0_i32_0 : i32, i32
  }
  func.func @transform_4(%arg0: i32) -> (i32, i32) {
    %c0_i32 = arith.constant 0 : i32
    %c0_i32_0 = arith.constant 0 : i32
    %c0_i32_1 = arith.constant 0 : i32
    return %c0_i32, %c0_i32_0 : i32, i32
  }
  func.func @transform_5(%arg0: i32) -> (i32, i32) {
    %c0_i32 = arith.constant 0 : i32
    %c0_i32_0 = arith.constant 0 : i32
    return %arg0, %c0_i32 : i32, i32
  }
}

</mosaic_0001>

<bundles_post_ra>
// kernel: projection_head.1
= control target key start
LH: loop header
LB: loop body
LE: loop exit
PB: predicated region body
PF: predicated region fallthrough
CT: control target
= control target key end

     0   :  { %10 = vsyncpa [#allocation3], 0  ;;  %s1024_s0 = inlined_call_operand.hbm [shape: f32[16,64], index: 0, kind: input, shape index: {}]   ;;  %s1025_s1 = inlined_call_operand.hbm [shape: bf16[64,512], index: 1, kind: input, shape index: {}]   ;;  %s1026_s2 = inlined_call_operand.vmem [shape: f32[1,512], index: 2, kind: input, shape index: {}]   ;;  %s1027_s3 = inlined_call_operand.hbm [shape: bf16[512,128], index: 3, kind: input, shape index: {}]   ;;  %s1028_s4 = inlined_call_operand.vmem [shape: f32[1,128], index: 4, kind: input, shape index: {}]   ;;  %s1029_s5 = inlined_call_operand.hbm [shape: f32[16,128], index: 5, kind: output, shape index: {}]  }
   0x1   :  { %11 = vsyncpa [#allocation6], 0 }
   0x2   :  { %12 = vsyncpa [#allocation4], 0  ;;  %s923_s18 = smov [#allocation5]   ;;  %s829_s22 = scalar_lea.hbm %s1025_s1, 2048 }
   0x3   :  { %s30_s19 = sshll.u32 %s923_s18, 4  ;;  %p830_p0 = scmp.ne.s32.totalorder %s1025_s1, %s829_s22  ;;  %s31_s19 = int_to_ptr.vmem [resolvable:$true] %s30_s19 }
   0x4   :  { %p833_p1 = scmp.lt.u32.totalorder %s829_s22, %s1025_s1 }
   0x6   :  { %p835_p2 = pnand %p833_p1, %p830_p0 }
   0x8   :  { %838 = shalt.err (!%p835_p2)
}
   0x9   :  { %s839_s27 = scalar_lea.vmem %s31_s19, 2048  ;;  %p844_p4 = scmp.lt.s32.totalorder %s31_s19, %s31_s19 }
   0xa   :  { %p840_p3 = scmp.ne.s32.totalorder %s31_s19, %s839_s27  ;;  %p845_p5 = scmp.lt.s32.totalorder %s839_s27, %s839_s27 }
   0xc   :  { %p846_p6 = por %p845_p5, %p844_p4 }
   0xe   :  { %p847_p7 = pnand %p846_p6, %p840_p3 }
  0x10   :  { %850 = shalt.err (!%p847_p7)
}
  0x11   :  { %s924_s28 = smov 256   ;;  %s925_s29 = smov 16  }
  0x12   :  { %36 = dma.hbm_to_vmem [thread:$0]  %s1025_s1, 2048, %s31_s19, [#allocation6], %s924_s28, %s924_s28, %s925_s29  }
  0x13   :  { %s926_s7 = smov [#allocation2]   ;;  %s851_s11 = scalar_lea.hbm %s1024_s0, 256 }
  0x14   :  { %s18_s8 = sshll.u32 %s926_s7, 4  ;;  %p852_p8 = scmp.ne.s32.totalorder %s1024_s0, %s851_s11  ;;  %s19_s8 = int_to_ptr.vmem [resolvable:$true] %s18_s8 }
  0x15   :  { %p855_p9 = scmp.lt.u32.totalorder %s851_s11, %s1024_s0 }
  0x17   :  { %p857_p10 = pnand %p855_p9, %p852_p8 }
  0x19   :  { %860 = shalt.err (!%p857_p10)
}
  0x1a   :  { %s861_s16 = scalar_lea.vmem %s19_s8, 256  ;;  %p866_p12 = scmp.lt.s32.totalorder %s19_s8, %s19_s8 }
  0x1b   :  { %p862_p11 = scmp.ne.s32.totalorder %s19_s8, %s861_s16  ;;  %p867_p13 = scmp.lt.s32.totalorder %s861_s16, %s861_s16 }
  0x1d   :  { %p868_p0 = por %p867_p13, %p866_p12 }
  0x1f   :  { %p869_p1 = pnand %p868_p0, %p862_p11 }
  0x21   :  { %872 = shalt.err (!%p869_p1)
}
  0x22   :  { %s927_s1 = smov 128   ;;  %s928_s17 = smov 8  }
  0x23   :  { %24 = dma.hbm_to_vmem [thread:$0]  %s1024_s0, 256, %s19_s8, [#allocation3], %s927_s1, %s927_s1, %s928_s17  }
  0x24   :  { %s929_s20 = smov [#allocation7]   ;;  %s873_s24 = scalar_lea.hbm %s1027_s3, 4096 }
  0x25   :  { %s44_s21 = sshll.u32 %s929_s20, 4  ;;  %p874_p2 = scmp.ne.s32.totalorder %s1027_s3, %s873_s24  ;;  %s45_s21 = int_to_ptr.vmem [resolvable:$true] %s44_s21 }
  0x26   :  { %p877_p3 = scmp.lt.u32.totalorder %s873_s24, %s1027_s3 }
  0x28   :  { %p879_p4 = pnand %p877_p3, %p874_p2 }
  0x2a   :  { %882 = shalt.err (!%p879_p4)
}
  0x2b   :  { %s883_s29 = scalar_lea.vmem %s45_s21, 4096  ;;  %p888_p6 = scmp.lt.s32.totalorder %s45_s21, %s45_s21 }
  0x2c   :  { %p884_p5 = scmp.ne.s32.totalorder %s45_s21, %s883_s29  ;;  %p889_p7 = scmp.lt.s32.totalorder %s883_s29, %s883_s29 }
  0x2e   :  { %p890_p8 = por %p889_p7, %p888_p6 }
  0x30   :  { %p891_p9 = pnand %p890_p8, %p884_p5 }
  0x32   :  { %894 = shalt.err (!%p891_p9)
}
  0x33   :  { %s930_s0 = smov 64   ;;  %s931_s30 = smov 4  }
  0x34   :  { %50 = dma.hbm_to_vmem [thread:$0]  %s1027_s3, 4096, %s45_s21, [#allocation6], %s930_s0, %s930_s0, %s931_s30  }
  0x35   :  { %917 = dma.done.wait [#allocation3], 256  }
  0x36   :  { %918 = vsyncadd [#allocation3], 4294967040 }
  0x37   :  { %919 = dma.done.wait [#allocation6], 6144  }
  0x38   :  { %920 = vsyncadd [#allocation6], 4294961152  ;;  %v932_v0 = vmov 0   ;;  %v769_v1 = vld [vmem:[#allocation5 + $0x4] ss:$16 sps:$4 sm:$0xff]   ;;  %v66_v18 = vld [vmem:[#allocation2 + $0x8] sm:$0xff]  ;;  %v85_v52 = vlaneseq }
  0x39   :  { %221 = vmatprep.mubr.bf16.mxu0 %v932_v0  ;;  %264 = vmatprep.mubr.bf16.mxu1 %v932_v0  ;;  %v771_v2 = vld [vmem:[#allocation5 + $0xc] ss:$16 sps:$4 sm:$0xff]   ;;  %v773_v3 = vld [vmem:[#allocation5] ss:$16 sps:$4 sm:$0xff]   ;;  %v774_v4 = vld [vmem:[#allocation5 + $0x8] ss:$16 sps:$4 sm:$0xff]  }
  0x3a   :  { %189 = vmatprep.subr.bf16.mxu0 %v769_v1  ;;  %232 = vmatprep.subr.bf16.mxu1 %v771_v2  ;;  %v775_v5 = vld [vmem:[#allocation5 + $0x24] ss:$16 sps:$4 sm:$0xff]   ;;  %v777_v6 = vld [vmem:[#allocation5 + $0x2c] ss:$16 sps:$4 sm:$0xff]   ;;  %v779_v7 = vld [vmem:[#allocation5 + $0x20] ss:$16 sps:$4 sm:$0xff]  }
  0x3b   :  { %190 = vmatpush1.bf16.msra.mxu0 %v773_v3  ;;  %233 = vmatpush1.bf16.msra.mxu1 %v774_v4  ;;  %v780_v8 = vld [vmem:[#allocation5 + $0x28] ss:$16 sps:$4 sm:$0xff]   ;;  %v781_v9 = vld [vmem:[#allocation5 + $0x44] ss:$16 sps:$4 sm:$0xff]   ;;  %v783_v10 = vld [vmem:[#allocation5 + $0x4c] ss:$16 sps:$4 sm:$0xff]  }
  0x3c   :  { %191 = vmatprep.subr.bf16.mxu0 %v775_v5  ;;  %234 = vmatprep.subr.bf16.mxu1 %v777_v6  ;;  %v785_v11 = vld [vmem:[#allocation5 + $0x40] ss:$16 sps:$4 sm:$0xff]   ;;  %v786_v12 = vld [vmem:[#allocation5 + $0x48] ss:$16 sps:$4 sm:$0xff]   ;;  %v787_v13 = vld [vmem:[#allocation5 + $0x64] ss:$16 sps:$4 sm:$0xff]  }
  0x3d   :  { %v789_v14 = vld [vmem:[#allocation5 + $0x6c] ss:$16 sps:$4 sm:$0xff]   ;;  %v791_v15 = vld [vmem:[#allocation5 + $0x60] ss:$16 sps:$4 sm:$0xff]   ;;  %v792_v16 = vld [vmem:[#allocation5 + $0x68] ss:$16 sps:$4 sm:$0xff]  }
  0x3e   :  { %v65_v17 = vld [vmem:[#allocation2] sm:$0xff]  ;;  %v793_v19 = vld [vmem:[#allocation7 + $0x40] sm:$0xff]   ;;  %vm185_vm0 = vcmask 523264   ;;  %v797_v24 = vld [vmem:[#allocation7 + $0x48] sm:$0xff]   ;;  %v86_v53 = vshrl.u32 %v85_v52, 7 }
  0x3f   :  { %192 = vmatpush1.bf16.msra.mxu0 %v779_v7  ;;  %235 = vmatpush1.bf16.msra.mxu1 %v780_v8  ;;  %v794_v20 = vld [vmem:[#allocation7 + $0xc0] sm:$0xff]   ;;  %v67_v22 = vpack.c.bf16 %v66_v18, %v65_v17  ;;  %v798_v25 = vld [vmem:[#allocation7 + $0xc8] sm:$0xff]   ;;  %v801_v28 = vld [vmem:[#allocation7 + $0x50] sm:$0xff]  }
  0x40   :  { %193 = vmatprep.subr.bf16.mxu0 %v781_v9  ;;  %236 = vmatprep.subr.bf16.mxu1 %v783_v10  ;;  %v795_v21 = vld [vmem:[#allocation7] sm:$0xff]   ;;  %v799_v26 = vld [vmem:[#allocation7 + $0x8] sm:$0xff]   ;;  %v802_v29 = vld [vmem:[#allocation7 + $0xd0] sm:$0xff]   ;;  %v87_v54 = vsub.s32 0, %v86_v53  ;;  %v95_v55 = vsub.s32 2, %v86_v53  ;;  %v91_v57 = vsub.s32 1, %v86_v53 }
  0x41   :  { %v796_v23 = vld [vmem:[#allocation7 + $0x80] sm:$0xff]   ;;  %v800_v27 = vld [vmem:[#allocation7 + $0x88] sm:$0xff]   ;;  %v803_v30 = vld [vmem:[#allocation7 + $0x10] sm:$0xff]   ;;  %v99_v58 = vsub.s32 3, %v86_v53 }
  0x42   :  { %v804_v31 = vld [vmem:[#allocation7 + $0x90] sm:$0xff]   ;;  %v805_v32 = vld [vmem:[#allocation7 + $0x58] sm:$0xff]   ;;  %v809_v36 = vld [vmem:[#allocation7 + $0x60] sm:$0xff]  }
  0x43   :  { %194 = vmatpush1.bf16.msra.mxu0 %v785_v11  ;;  %237 = vmatpush1.bf16.msra.mxu1 %v786_v12  ;;  %v806_v33 = vld [vmem:[#allocation7 + $0xd8] sm:$0xff]   ;;  %v810_v37 = vld [vmem:[#allocation7 + $0xe0] sm:$0xff]   ;;  %v813_v40 = vld [vmem:[#allocation7 + $0x68] sm:$0xff]  }
  0x44   :  { %195 = vmatprep.subr.bf16.mxu0 %v787_v13  ;;  %238 = vmatprep.subr.bf16.mxu1 %v789_v14  ;;  %v807_v34 = vld [vmem:[#allocation7 + $0x18] sm:$0xff]   ;;  %v811_v38 = vld [vmem:[#allocation7 + $0x20] sm:$0xff]   ;;  %v814_v41 = vld [vmem:[#allocation7 + $0xe8] sm:$0xff]  }
  0x45   :  { %v808_v35 = vld [vmem:[#allocation7 + $0x98] sm:$0xff]   ;;  %v812_v39 = vld [vmem:[#allocation7 + $0xa0] sm:$0xff]   ;;  %v815_v42 = vld [vmem:[#allocation7 + $0x28] sm:$0xff]  }
  0x46   :  { %v816_v43 = vld [vmem:[#allocation7 + $0xa8] sm:$0xff]   ;;  %v817_v44 = vld [vmem:[#allocation7 + $0x70] sm:$0xff]   ;;  %v821_v48 = vld [vmem:[#allocation7 + $0x78] sm:$0xff]  }
  0x47   :  { %196 = vmatpush1.bf16.msra.mxu0 %v791_v15  ;;  %239 = vmatpush1.bf16.msra.mxu1 %v792_v16  ;;  %v818_v45 = vld [vmem:[#allocation7 + $0xf0] sm:$0xff]   ;;  %v822_v49 = vld [vmem:[#allocation7 + $0xf8] sm:$0xff]  }
  0x48   :  { %714 = vmatprep.subr.bf16.mxu0 %v793_v19  ;;  %736 = vmatprep.subr.bf16.mxu1 %v794_v20  ;;  %v819_v46 = vld [vmem:[#allocation7 + $0x30] sm:$0xff]   ;;  %v823_v50 = vld [vmem:[#allocation7 + $0x38] sm:$0xff]  }
  0x49   :  { %v820_v47 = vld [vmem:[#allocation7 + $0xb0] sm:$0xff]   ;;  %v824_v51 = vld [vmem:[#allocation7 + $0xb8] sm:$0xff]  }
  0x4a   :  { %679 = vmatmul.mubr.msk.bf16.vlgmr.msra.gmra.mrb[0].mxu0 %vm185_vm0, %v67_v22  ;;  %680 = vmatmul.mubr.msk.bf16.vlgmr.msra.gmra.mrb[0].mxu1 %vm185_vm0, %v67_v22  ;;  %v63_v56 = vld [vmem:[%s1026_s2] sm:$0xf] }
  0x4b   :  { %715 = vmatpush3.bf16.msra.mxu0 %v795_v21  ;;  %737 = vmatpush3.bf16.msra.mxu1 %v796_v23  ;;  %v88_v59 = vrot.slane %v63_v56, %v87_v54  ;;  %v96_v60 = vrot.slane %v63_v56, %v95_v55  ;;  %v92_v61 = vrot.slane %v63_v56, %v91_v57 }
  0x4c   :  { %716 = vmatprep.subr.bf16.mxu0 %v797_v24  ;;  %738 = vmatprep.subr.bf16.mxu1 %v798_v25  ;;  %v100_v62 = vrot.slane %v63_v56, %v99_v58 }
  0x4f   :  { %717 = vmatpush3.bf16.msra.mxu0 %v799_v26  ;;  %739 = vmatpush3.bf16.msra.mxu1 %v800_v27 }
  0x50   :  { %718 = vmatprep.subr.bf16.mxu0 %v801_v28  ;;  %740 = vmatprep.subr.bf16.mxu1 %v802_v29  ;;  %v681_v29 = vld [vmem:[%s1028_s4] ss:$0 sm:$0xff]  ;;  %s933_s4 = smov [#allocation8]  }
  0x51   :  { %s650_s10 = sshll.u32 %s933_s4, 4  ;;  %s651_s10 = int_to_ptr.vmem [resolvable:$true] %s650_s10 }
  0x52   :  { %s895_s11 = scalar_lea.vmem %s651_s10, 256  ;;  %p900_p11 = scmp.lt.s32.totalorder %s651_s10, %s651_s10 }
  0x53   :  { %719 = vmatpush3.bf16.msra.mxu0 %v803_v30  ;;  %741 = vmatpush3.bf16.msra.mxu1 %v804_v31  ;;  %p896_p10 = scmp.ne.s32.totalorder %s651_s10, %s895_s11  ;;  %p901_p12 = scmp.lt.s32.totalorder %s895_s11, %s895_s11 }
  0x54   :  { %720 = vmatprep.subr.bf16.mxu0 %v805_v32  ;;  %742 = vmatprep.subr.bf16.mxu1 %v806_v33 }
  0x55   :  { %p902_p13 = por %p901_p12, %p900_p11 }
  0x57   :  { %721 = vmatpush3.bf16.msra.mxu0 %v807_v34  ;;  %743 = vmatpush3.bf16.msra.mxu1 %v808_v35  ;;  %p903_p0 = pnand %p902_p13, %p896_p10 }
  0x58   :  { %722 = vmatprep.subr.bf16.mxu0 %v809_v36  ;;  %744 = vmatprep.subr.bf16.mxu1 %v810_v37 }
  0x5b   :  { %723 = vmatpush3.bf16.msra.mxu0 %v811_v38  ;;  %745 = vmatpush3.bf16.msra.mxu1 %v812_v39 }
  0x5c   :  { %724 = vmatprep.subr.bf16.mxu0 %v813_v40  ;;  %746 = vmatprep.subr.bf16.mxu1 %v814_v41 }
  0x5f   :  { %725 = vmatpush3.bf16.msra.mxu0 %v815_v42  ;;  %747 = vmatpush3.bf16.msra.mxu1 %v816_v43 }
  0x60   :  { %726 = vmatprep.subr.bf16.mxu0 %v817_v44  ;;  %748 = vmatprep.subr.bf16.mxu1 %v818_v45 }
  0x63   :  { %727 = vmatpush3.bf16.msra.mxu0 %v819_v46  ;;  %749 = vmatpush3.bf16.msra.mxu1 %v820_v47 }
  0x64   :  { %728 = vmatprep.subr.bf16.mxu0 %v821_v48  ;;  %750 = vmatprep.subr.bf16.mxu1 %v822_v49 }
  0x67   :  { %729 = vmatpush3.bf16.msra.mxu0 %v823_v50  ;;  %751 = vmatpush3.bf16.msra.mxu1 %v824_v51 }
 0x11d   :  { %v223_v63 = vpop.f32.mrb[0].mxu0  ;;  %v266_v0 = vpop.f32.mrb[0].mxu1 }
 0x11e   :  { %v224_v1 = vadd.f32 %v223_v63, %v88_v59  ;;  %v267_v2 = vadd.f32 %v266_v0, %v96_v60  ;;  %v225_v3 = vpop.f32.mrb[1].mxu0  ;;  %v268_v4 = vpop.f32.mrb[1].mxu1 }
 0x11f   :  { %v226_v5 = vadd.f32 %v225_v3, %v92_v61  ;;  %v269_v6 = vadd.f32 %v268_v4, %v100_v62  ;;  %v227_v7 = vpop.f32.mrb[2].mxu0  ;;  %v270_v8 = vpop.f32.mrb[2].mxu1 }
 0x120   :  { %v277_v9 = vmax.f32 %v267_v2, 0.0  ;;  %v228_v10 = vadd.f32 %v227_v7, %v88_v59  ;;  %v271_v11 = vadd.f32 %v270_v8, %v96_v60  ;;  %v229_v12 = vpop.f32.mrb[3].mxu0  ;;  %v272_v13 = vpop.f32.mrb[3].mxu1  ;;  %v275_v17 = vmax.f32 %v224_v1, 0.0 }
 0x121   :  { %v278_v14 = vmax.f32 %v269_v6, 0.0  ;;  %v230_v15 = vadd.f32 %v229_v12, %v92_v61  ;;  %v273_v16 = vadd.f32 %v272_v13, %v100_v62  ;;  %v276_v20 = vmax.f32 %v226_v5, 0.0 }
 0x122   :  { %v279_v18 = vmax.f32 %v228_v10, 0.0  ;;  %v281_v19 = vmax.f32 %v271_v11, 0.0 }
 0x123   :  { %v280_v21 = vmax.f32 %v230_v15, 0.0  ;;  %v282_v22 = vmax.f32 %v273_v16, 0.0 }
 0x124   :  { %v283_v23 = vpack.c.bf16 %v279_v18, %v275_v17  ;;  %v285_v24 = vpack.c.bf16 %v281_v19, %v277_v9 }
 0x125   :  { %v284_v25 = vpack.c.bf16 %v280_v21, %v276_v20  ;;  %v286_v26 = vpack.c.bf16 %v282_v22, %v278_v14 }
 0x127   :  { %581 = vmatprep.mubr.bf16.mxu0 %v284_v25  ;;  %622 = vmatprep.mubr.bf16.mxu1 %v286_v26 }
 0x128   :  { %582 = vmatmul.mubr.bf16.vlgmr.msra.gmra.mrb[4].mxu0 %v283_v23  ;;  %623 = vmatmul.mubr.bf16.vlgmr.msra.gmra.mrb[4].mxu1 %v285_v24 }
 0x1fb   :  { %v730_v27 = vpop.f32.mrb[4].mxu0  ;;  %v752_v28 = vpop.f32.mrb[4].mxu1 }
 0x1fc   :  { %v731_v30 = vpop.f32.mrb[5].mxu0  ;;  %v753_v31 = vpop.f32.mrb[5].mxu1 }
 0x1fd   :  { %v732_v32 = vadd.f32 %v731_v30, %v730_v27  ;;  %v754_v33 = vadd.f32 %v753_v31, %v752_v28  ;;  %v733_v34 = vpop.f32.mrb[6].mxu0  ;;  %v755_v35 = vpop.f32.mrb[6].mxu1 }
 0x1fe   :  { %v734_v36 = vpop.f32.mrb[7].mxu0  ;;  %v756_v37 = vpop.f32.mrb[7].mxu1 }
 0x1ff   :  { %v584_v38 = vadd.f32 %v732_v32, %v681_v29  ;;  %v735_v39 = vadd.f32 %v734_v36, %v733_v34  ;;  %v757_v40 = vadd.f32 %v756_v37, %v755_v35 }
 0x201   :  { %v587_v41 = vadd.f32 %v735_v39, %v681_v29  ;;  %v625_v42 = vadd.f32 %v754_v33, %v584_v38 }
 0x203   :  { %v628_v43 = vadd.f32 %v757_v40, %v587_v41  ;;  %v631_v44 = vmul.f32 %v625_v42, %v625_v42 }
 0x205   :  { %633 = vadd.xlane.f32.xlu0 %v631_v44  ;;  %v632_v45 = vmul.f32 %v628_v43, %v628_v43 }
 0x209   :  { %635 = vadd.xlane.f32.xlu0 %v632_v45 }
 0x292   :  { %v634_v46 = vpop.xlane.xlu0 %633 }
 0x293   :  { %v637_v47 = vmax.f32 %v634_v46, 1e-24 }
 0x295   :  { %825 = vrsqrt.f32 %v637_v47 }
 0x296   :  { %v636_v48 = vpop.xlane.xlu0 %635 }
 0x297   :  { %v638_v49 = vmax.f32 %v636_v48, 1e-24 }
 0x299   :  { %827 = vrsqrt.f32 %v638_v49 }
 0x29f   :  { %v826_v50 = vpop.eup %825 }
 0x2a0   :  { %v641_v51 = vmul.f32 %v826_v50, %v625_v42 }
 0x2a2   :  { %643 = vst [vmem:[#allocation8] sm:$0xff] %v641_v51 }
 0x2a3   :  { %v828_v52 = vpop.eup %827 }
 0x2a4   :  { %v642_v53 = vmul.f32 %v828_v52, %v628_v43 }
 0x2a6   :  { %644 = vst [vmem:[#allocation8 + $0x8] sm:$0xff] %v642_v53 }
 0x2a7   :  { %906 = shalt.err (!%p903_p0)
}
 0x2a8   :  { %s907_s14 = scalar_lea.hbm %s1029_s5, 256 }
 0x2a9   :  { %p908_p1 = scmp.ne.s32.totalorder %s1029_s5, %s907_s14  ;;  %p911_p2 = scmp.lt.u32.totalorder %s907_s14, %s1029_s5 }
 0x2ab   :  { %p913_p3 = pnand %p911_p2, %p908_p1 }
 0x2ad   :  { %916 = shalt.err (!%p913_p3)
}
 0x2ae   :  { %656 = dma.vmem_to_hbm [thread:$0]  %s651_s10, 256, %s1029_s5, [#allocation4], %s927_s1, %s927_s1, %s928_s17  }
 0x2af   :  { %921 = dma.done.wait [#allocation4], 256  }
 0x2b0   :  { %922 = vsyncadd [#allocation4], 4294967040 }
 0x2b1   :  { %660 = vsyncpa [#allocation3], 1 }
 0x2b2   :  { %661 = vsyncpa [#allocation6], 1 }
 0x2b3   :  { %662 = vsyncpa [#allocation4], 1 }

</bundles_post_ra>
